<compile_context>
chip_gen: v7x
topology: tpu7x:2x2x1
jax: 0.10.0
libtpu: 0.0.40
codegen_flags: <defaults>
</compile_context>

<pallas_src>
import functools

import jax
import jax.numpy as jnp
from jax import lax
from jax.experimental import pallas as pl
from jax.experimental.pallas import tpu as pltpu


def _round_up(x, m):
    return (x + m - 1) // m * m


# ----------------------------------------------------------------------------
# Pallas kernel: fused gather (DMA) + single predictor matmul for both branches
# ----------------------------------------------------------------------------
def _fused_gather_predictor_kernel(
        uidx_ref, iidx_ref,          # SMEM scalar prefetch: (B,) int32 each
        uon_hbm, ion_hbm,            # HBM refs (pl.ANY): (n_users, D), (n_items, D)
        w_ref, b_ref,                # VMEM: (Dp, D) weight, (1, Dp) bias (zero-padded)
        out_ref,                     # VMEM: (2*B_pad, Dp) lane-dense output
        x_buf, sem,                  # scratch: VMEM (2*B_pad, D), DMA sems (2, B)
        *, B, B_pad):
    D = x_buf.shape[1]

    # Zero staging rows that are never gathered into (only when B % 8 != 0);
    # their outputs are discarded by the wrapper but keep them deterministic.
    if B_pad > B:
        pad = B_pad - B
        x_buf[B:B_pad, :] = jnp.zeros((pad, D), x_buf.dtype)
        x_buf[B_pad + B:, :] = jnp.zeros((pad, D), x_buf.dtype)

    # Gather online-embedding rows straight HBM -> VMEM. Issue all DMAs first,
    # then wait, so the row copies overlap each other.
    copies = []
    for r in range(B):
        u_row = uidx_ref[r]
        cp_u = pltpu.make_async_copy(uon_hbm.at[pl.ds(u_row, 1)],
                                     x_buf.at[pl.ds(r, 1)],
                                     sem.at[0, r])
        cp_u.start()
        copies.append(cp_u)

        i_row = iidx_ref[r]
        cp_i = pltpu.make_async_copy(ion_hbm.at[pl.ds(i_row, 1)],
                                     x_buf.at[pl.ds(B_pad + r, 1)],
                                     sem.at[1, r])
        cp_i.start()
        copies.append(cp_i)
    for cp in copies:
        cp.wait()

    # Single MXU matmul for user + item branches: x @ W^T without
    # materializing W^T (contract axis 1 of x with axis 1 of W).
    acc = lax.dot_general(
        x_buf[...], w_ref[...],
        dimension_numbers=(((1,), (1,)), ((), ())),
        preferred_element_type=jnp.float32)
    out_ref[...] = (acc + b_ref[...]).astype(out_ref.dtype)


# ----------------------------------------------------------------------------
# Wrapper: scalar-prefetch grid spec, padding to lane-dense output, slicing
# ----------------------------------------------------------------------------
def _predictor_pallas(user_idx, item_idx, user_table, item_table, w, b):
    B = user_idx.shape[0]
    D_out, D_in = w.shape                 # (latent, latent)
    Dp = _round_up(D_out, 128)            # lane-dense output width
    B_pad = _round_up(B, 8)               # sublane-aligned row blocks
    M = 2 * B_pad                         # user rows | item rows

    # Pad only the OUTPUT dimension of W / b with zeros: padded output lanes
    # come out exactly zero and are sliced away below (contraction dim is D_in).
    w_pad = jnp.pad(w.astype(jnp.float32), ((0, Dp - D_out), (0, 0)))   # (Dp, D_in)
    b_pad = jnp.pad(b.astype(jnp.float32), (0, Dp - D_out)).reshape(1, Dp)

    kernel = functools.partial(_fused_gather_predictor_kernel, B=B, B_pad=B_pad)

    flops = 2 * M * D_in * Dp
    bytes_accessed = 4 * (2 * B * D_in          # gathered embedding rows
                          + Dp * D_in + Dp      # weight + bias
                          + M * Dp)             # output
    out = pl.pallas_call(
        kernel,
        out_shape=jax.ShapeDtypeStruct((M, Dp), jnp.float32),
        grid_spec=pltpu.PrefetchScalarGridSpec(
            num_scalar_prefetch=2,
            grid=(1,),
            in_specs=[
                pl.BlockSpec(memory_space=pl.ANY),            # user_online table (HBM)
                pl.BlockSpec(memory_space=pl.ANY),            # item_online table (HBM)
                pl.BlockSpec((Dp, D_in), lambda *_: (0, 0)),  # predictor weight
                pl.BlockSpec((1, Dp), lambda *_: (0, 0)),     # predictor bias
            ],
            out_specs=pl.BlockSpec((M, Dp), lambda *_: (0, 0)),
            scratch_shapes=[
                pltpu.VMEM((M, D_in), jnp.float32),           # gathered rows
                pltpu.SemaphoreType.DMA((2, B)),              # per-row DMA sems
            ]),
        compiler_params=pltpu.CompilerParams(
            dimension_semantics=("arbitrary",)),
        cost_estimate=pl.CostEstimate(
            flops=flops, transcendentals=0, bytes_accessed=bytes_accessed),
    )(user_idx, item_idx, user_table, item_table, w_pad, b_pad)

    u_online = out[:B, :D_out]
    i_online = out[B_pad:B_pad + B, :D_out]
    return u_online, i_online


# ----------------------------------------------------------------------------
# Parameter construction (deterministic, mirrors BUIR_ID.__init__)
# ----------------------------------------------------------------------------
def init_buir_params(key, user_count, item_count, latent_size):
    k_u, k_i, k_w, k_b = jax.random.split(key, 4)

    def xavier_normal(k, shape):
        fan_in, fan_out = shape[1], shape[0]
        std = jnp.sqrt(2.0 / (fan_in + fan_out))
        return jax.random.normal(k, shape, dtype=jnp.float32) * std

    user_online = xavier_normal(k_u, (user_count, latent_size))
    item_online = xavier_normal(k_i, (item_count, latent_size))
    # _init_target(): target tables are copies of the online tables.
    return {
        "user_online": user_online,
        "user_target": user_online,
        "item_online": item_online,
        "item_target": item_online,
        "pred_w": xavier_normal(k_w, (latent_size, latent_size)),  # (out, in)
        "pred_b": jax.random.normal(k_b, (latent_size,), dtype=jnp.float32),
    }


# ----------------------------------------------------------------------------
# Forward pass (matches BUIR_ID.forward)
# ----------------------------------------------------------------------------
@jax.jit
def buir_forward(params, user_idx, item_idx):
    u_online, i_online = _predictor_pallas(
        user_idx, item_idx,
        params["user_online"], params["item_online"],
        params["pred_w"], params["pred_b"])
    # Target embeddings: pure gathers with no compute attached -> plain JAX.
    u_target = params["user_target"][user_idx]
    i_target = params["item_target"][item_idx]
    return u_online, u_target, i_online, i_target


# Pure-JAX reference for validation
def buir_forward_ref(params, user_idx, item_idx):
    u_emb = params["user_online"][user_idx]
    i_emb = params["item_online"][item_idx]
    w, b = params["pred_w"], params["pred_b"]
    u_online = u_emb @ w.T + b
    i_online = i_emb @ w.T + b
    return (u_online, params["user_target"][user_idx],
            i_online, params["item_target"][item_idx])


if __name__ == "__main__":
    user_count, item_count, latent_size, momentum = 64, 128, 32, 0.995
    batch = 8

    key = jax.random.PRNGKey(0)
    k_params, k_user, k_item = jax.random.split(key, 3)
    params = init_buir_params(k_params, user_count, item_count, latent_size)

    user_idx = jax.random.randint(k_user, (batch,), 0, user_count, dtype=jnp.int32)
    item_idx = jax.random.randint(k_item, (batch,), 0, item_count, dtype=jnp.int32)

    out = buir_forward(params, user_idx, item_idx)
    out = jax.block_until_ready(out)

    ref = buir_forward_ref(params, user_idx, item_idx)
    for o, r in zip(out, ref):
        assert o.shape == r.shape and o.dtype == jnp.float32
        assert jnp.allclose(o, r, atol=1e-5, rtol=1e-5)

    print("KERNEL_OK")
</pallas_src>

<mosaic_0001>
module attributes {stable_mosaic.version = 11 : i64} {
  func.func @_fused_gather_predictor_kernel(%arg0: i32, %arg1: memref<8xi32, #tpu.memory_space<smem>>, %arg2: memref<8xi32, #tpu.memory_space<smem>>, %arg3: memref<64x32xf32, #tpu.memory_space<any>>, %arg4: memref<128x32xf32, #tpu.memory_space<any>>, %arg5: memref<128x32xf32, #tpu.memory_space<vmem>>, %arg6: memref<1x128xf32, #tpu.memory_space<vmem>>, %arg7: memref<16x128xf32, #tpu.memory_space<vmem>>, %arg8: memref<16x32xf32, #tpu.memory_space<vmem>>, %arg9: memref<2x8x!tpu.dma_semaphore, #tpu.memory_space<semaphore_mem>>) attributes {dimension_semantics = [#tpu.dimension_semantics<arbitrary>], iteration_bounds = array<i64: 1>, scalar_prefetch = 2 : i64, scratch_operands = 2 : i64, tpu.core_type = #tpu.core_type<tc>, window_params = [{}, {}, {pipeline_mode = #tpu.pipeline_mode<synchronous>, transform_indices = @transform_2, window_bounds = array<i64: 128, 32>}, {pipeline_mode = #tpu.pipeline_mode<synchronous>, transform_indices = @transform_3, window_bounds = array<i64: 1, 128>}, {pipeline_mode = #tpu.pipeline_mode<synchronous>, transform_indices = @transform_4, window_bounds = array<i64: 16, 128>}]} {
    %c0 = arith.constant 0 : index
    %0 = memref.load %arg1[%c0] : memref<8xi32, #tpu.memory_space<smem>>
    %c0_i32 = arith.constant 0 : i32
    %c0_i32_0 = arith.constant 0 : i32
    %c0_i32_1 = arith.constant 0 : i32
    %1 = tpu.memref_slice %arg3[%0, %c0_i32_1] : memref<64x32xf32, #tpu.memory_space<any>> -> memref<1x32xf32, #tpu.memory_space<any>>
    %c0_i32_2 = arith.constant 0 : i32
    %c0_i32_3 = arith.constant 0 : i32
    %2 = tpu.memref_slice %arg8[%c0_i32_2, %c0_i32_3] : memref<16x32xf32, #tpu.memory_space<vmem>> -> memref<1x32xf32, #tpu.memory_space<vmem>>
    %3 = tpu.memref_slice %arg9[%c0_i32, %c0_i32_0] : memref<2x8x!tpu.dma_semaphore, #tpu.memory_space<semaphore_mem>> -> memref<1x1x!tpu.dma_semaphore, #tpu.memory_space<semaphore_mem>>
    %4 = tpu.memref_squeeze %3 : memref<1x1x!tpu.dma_semaphore, #tpu.memory_space<semaphore_mem>> -> memref<!tpu.dma_semaphore, #tpu.memory_space<semaphore_mem>>
    tpu.enqueue_dma source(%1 : memref<1x32xf32, #tpu.memory_space<any>>) target(%2 : memref<1x32xf32, #tpu.memory_space<vmem>>) target_semaphore(%4 : memref<!tpu.dma_semaphore, #tpu.memory_space<semaphore_mem>>)
    %c0_4 = arith.constant 0 : index
    %5 = memref.load %arg2[%c0_4] : memref<8xi32, #tpu.memory_space<smem>>
    %c1_i32 = arith.constant 1 : i32
    %c0_i32_5 = arith.constant 0 : i32
    %c0_i32_6 = arith.constant 0 : i32
    %6 = tpu.memref_slice %arg4[%5, %c0_i32_6] : memref<128x32xf32, #tpu.memory_space<any>> -> memref<1x32xf32, #tpu.memory_space<any>>
    %c8_i32 = arith.constant 8 : i32
    %c0_i32_7 = arith.constant 0 : i32
    %7 = tpu.memref_slice %arg8[%c8_i32, %c0_i32_7] : memref<16x32xf32, #tpu.memory_space<vmem>> -> memref<1x32xf32, #tpu.memory_space<vmem>>
    %8 = tpu.memref_slice %arg9[%c1_i32, %c0_i32_5] : memref<2x8x!tpu.dma_semaphore, #tpu.memory_space<semaphore_mem>> -> memref<1x1x!tpu.dma_semaphore, #tpu.memory_space<semaphore_mem>>
    %9 = tpu.memref_squeeze %8 : memref<1x1x!tpu.dma_semaphore, #tpu.memory_space<semaphore_mem>> -> memref<!tpu.dma_semaphore, #tpu.memory_space<semaphore_mem>>
    tpu.enqueue_dma source(%6 : memref<1x32xf32, #tpu.memory_space<any>>) target(%7 : memref<1x32xf32, #tpu.memory_space<vmem>>) target_semaphore(%9 : memref<!tpu.dma_semaphore, #tpu.memory_space<semaphore_mem>>)
    %c1 = arith.constant 1 : index
    %10 = memref.load %arg1[%c1] : memref<8xi32, #tpu.memory_space<smem>>
    %c0_i32_8 = arith.constant 0 : i32
    %c1_i32_9 = arith.constant 1 : i32
    %c0_i32_10 = arith.constant 0 : i32
    %11 = tpu.memref_slice %arg3[%10, %c0_i32_10] : memref<64x32xf32, #tpu.memory_space<any>> -> memref<1x32xf32, #tpu.memory_space<any>>
    %c1_i32_11 = arith.constant 1 : i32
    %c0_i32_12 = arith.constant 0 : i32
    %12 = tpu.memref_slice %arg8[%c1_i32_11, %c0_i32_12] : memref<16x32xf32, #tpu.memory_space<vmem>> -> memref<1x32xf32, #tpu.memory_space<vmem>>
    %13 = tpu.memref_slice %arg9[%c0_i32_8, %c1_i32_9] : memref<2x8x!tpu.dma_semaphore, #tpu.memory_space<semaphore_mem>> -> memref<1x1x!tpu.dma_semaphore, #tpu.memory_space<semaphore_mem>>
    %14 = tpu.memref_squeeze %13 : memref<1x1x!tpu.dma_semaphore, #tpu.memory_space<semaphore_mem>> -> memref<!tpu.dma_semaphore, #tpu.memory_space<semaphore_mem>>
    tpu.enqueue_dma source(%11 : memref<1x32xf32, #tpu.memory_space<any>>) target(%12 : memref<1x32xf32, #tpu.memory_space<vmem>>) target_semaphore(%14 : memref<!tpu.dma_semaphore, #tpu.memory_space<semaphore_mem>>)
    %c1_13 = arith.constant 1 : index
    %15 = memref.load %arg2[%c1_13] : memref<8xi32, #tpu.memory_space<smem>>
    %c1_i32_14 = arith.constant 1 : i32
    %c1_i32_15 = arith.constant 1 : i32
    %c0_i32_16 = arith.constant 0 : i32
    %16 = tpu.memref_slice %arg4[%15, %c0_i32_16] : memref<128x32xf32, #tpu.memory_space<any>> -> memref<1x32xf32, #tpu.memory_space<any>>
    %c9_i32 = arith.constant 9 : i32
    %c0_i32_17 = arith.constant 0 : i32
    %17 = tpu.memref_slice %arg8[%c9_i32, %c0_i32_17] : memref<16x32xf32, #tpu.memory_space<vmem>> -> memref<1x32xf32, #tpu.memory_space<vmem>>
    %18 = tpu.memref_slice %arg9[%c1_i32_14, %c1_i32_15] : memref<2x8x!tpu.dma_semaphore, #tpu.memory_space<semaphore_mem>> -> memref<1x1x!tpu.dma_semaphore, #tpu.memory_space<semaphore_mem>>
    %19 = tpu.memref_squeeze %18 : memref<1x1x!tpu.dma_semaphore, #tpu.memory_space<semaphore_mem>> -> memref<!tpu.dma_semaphore, #tpu.memory_space<semaphore_mem>>
    tpu.enqueue_dma source(%16 : memref<1x32xf32, #tpu.memory_space<any>>) target(%17 : memref<1x32xf32, #tpu.memory_space<vmem>>) target_semaphore(%19 : memref<!tpu.dma_semaphore, #tpu.memory_space<semaphore_mem>>)
    %c2 = arith.constant 2 : index
    %20 = memref.load %arg1[%c2] : memref<8xi32, #tpu.memory_space<smem>>
    %c0_i32_18 = arith.constant 0 : i32
    %c2_i32 = arith.constant 2 : i32
    %c0_i32_19 = arith.constant 0 : i32
    %21 = tpu.memref_slice %arg3[%20, %c0_i32_19] : memref<64x32xf32, #tpu.memory_space<any>> -> memref<1x32xf32, #tpu.memory_space<any>>
    %c2_i32_20 = arith.constant 2 : i32
    %c0_i32_21 = arith.constant 0 : i32
    %22 = tpu.memref_slice %arg8[%c2_i32_20, %c0_i32_21] : memref<16x32xf32, #tpu.memory_space<vmem>> -> memref<1x32xf32, #tpu.memory_space<vmem>>
    %23 = tpu.memref_slice %arg9[%c0_i32_18, %c2_i32] : memref<2x8x!tpu.dma_semaphore, #tpu.memory_space<semaphore_mem>> -> memref<1x1x!tpu.dma_semaphore, #tpu.memory_space<semaphore_mem>>
    %24 = tpu.memref_squeeze %23 : memref<1x1x!tpu.dma_semaphore, #tpu.memory_space<semaphore_mem>> -> memref<!tpu.dma_semaphore, #tpu.memory_space<semaphore_mem>>
    tpu.enqueue_dma source(%21 : memref<1x32xf32, #tpu.memory_space<any>>) target(%22 : memref<1x32xf32, #tpu.memory_space<vmem>>) target_semaphore(%24 : memref<!tpu.dma_semaphore, #tpu.memory_space<semaphore_mem>>)
    %c2_22 = arith.constant 2 : index
    %25 = memref.load %arg2[%c2_22] : memref<8xi32, #tpu.memory_space<smem>>
    %c1_i32_23 = arith.constant 1 : i32
    %c2_i32_24 = arith.constant 2 : i32
    %c0_i32_25 = arith.constant 0 : i32
    %26 = tpu.memref_slice %arg4[%25, %c0_i32_25] : memref<128x32xf32, #tpu.memory_space<any>> -> memref<1x32xf32, #tpu.memory_space<any>>
    %c10_i32 = arith.constant 10 : i32
    %c0_i32_26 = arith.constant 0 : i32
    %27 = tpu.memref_slice %arg8[%c10_i32, %c0_i32_26] : memref<16x32xf32, #tpu.memory_space<vmem>> -> memref<1x32xf32, #tpu.memory_space<vmem>>
    %28 = tpu.memref_slice %arg9[%c1_i32_23, %c2_i32_24] : memref<2x8x!tpu.dma_semaphore, #tpu.memory_space<semaphore_mem>> -> memref<1x1x!tpu.dma_semaphore, #tpu.memory_space<semaphore_mem>>
    %29 = tpu.memref_squeeze %28 : memref<1x1x!tpu.dma_semaphore, #tpu.memory_space<semaphore_mem>> -> memref<!tpu.dma_semaphore, #tpu.memory_space<semaphore_mem>>
    tpu.enqueue_dma source(%26 : memref<1x32xf32, #tpu.memory_space<any>>) target(%27 : memref<1x32xf32, #tpu.memory_space<vmem>>) target_semaphore(%29 : memref<!tpu.dma_semaphore, #tpu.memory_space<semaphore_mem>>)
    %c3 = arith.constant 3 : index
    %30 = memref.load %arg1[%c3] : memref<8xi32, #tpu.memory_space<smem>>
    %c0_i32_27 = arith.constant 0 : i32
    %c3_i32 = arith.constant 3 : i32
    %c0_i32_28 = arith.constant 0 : i32
    %31 = tpu.memref_slice %arg3[%30, %c0_i32_28] : memref<64x32xf32, #tpu.memory_space<any>> -> memref<1x32xf32, #tpu.memory_space<any>>
    %c3_i32_29 = arith.constant 3 : i32
    %c0_i32_30 = arith.constant 0 : i32
    %32 = tpu.memref_slice %arg8[%c3_i32_29, %c0_i32_30] : memref<16x32xf32, #tpu.memory_space<vmem>> -> memref<1x32xf32, #tpu.memory_space<vmem>>
    %33 = tpu.memref_slice %arg9[%c0_i32_27, %c3_i32] : memref<2x8x!tpu.dma_semaphore, #tpu.memory_space<semaphore_mem>> -> memref<1x1x!tpu.dma_semaphore, #tpu.memory_space<semaphore_mem>>
    %34 = tpu.memref_squeeze %33 : memref<1x1x!tpu.dma_semaphore, #tpu.memory_space<semaphore_mem>> -> memref<!tpu.dma_semaphore, #tpu.memory_space<semaphore_mem>>
    tpu.enqueue_dma source(%31 : memref<1x32xf32, #tpu.memory_space<any>>) target(%32 : memref<1x32xf32, #tpu.memory_space<vmem>>) target_semaphore(%34 : memref<!tpu.dma_semaphore, #tpu.memory_space<semaphore_mem>>)
    %c3_31 = arith.constant 3 : index
    %35 = memref.load %arg2[%c3_31] : memref<8xi32, #tpu.memory_space<smem>>
    %c1_i32_32 = arith.constant 1 : i32
    %c3_i32_33 = arith.constant 3 : i32
    %c0_i32_34 = arith.constant 0 : i32
    %36 = tpu.memref_slice %arg4[%35, %c0_i32_34] : memref<128x32xf32, #tpu.memory_space<any>> -> memref<1x32xf32, #tpu.memory_space<any>>
    %c11_i32 = arith.constant 11 : i32
    %c0_i32_35 = arith.constant 0 : i32
    %37 = tpu.memref_slice %arg8[%c11_i32, %c0_i32_35] : memref<16x32xf32, #tpu.memory_space<vmem>> -> memref<1x32xf32, #tpu.memory_space<vmem>>
    %38 = tpu.memref_slice %arg9[%c1_i32_32, %c3_i32_33] : memref<2x8x!tpu.dma_semaphore, #tpu.memory_space<semaphore_mem>> -> memref<1x1x!tpu.dma_semaphore, #tpu.memory_space<semaphore_mem>>
    %39 = tpu.memref_squeeze %38 : memref<1x1x!tpu.dma_semaphore, #tpu.memory_space<semaphore_mem>> -> memref<!tpu.dma_semaphore, #tpu.memory_space<semaphore_mem>>
    tpu.enqueue_dma source(%36 : memref<1x32xf32, #tpu.memory_space<any>>) target(%37 : memref<1x32xf32, #tpu.memory_space<vmem>>) target_semaphore(%39 : memref<!tpu.dma_semaphore, #tpu.memory_space<semaphore_mem>>)
    %c4 = arith.constant 4 : index
    %40 = memref.load %arg1[%c4] : memref<8xi32, #tpu.memory_space<smem>>
    %c0_i32_36 = arith.constant 0 : i32
    %c4_i32 = arith.constant 4 : i32
    %c0_i32_37 = arith.constant 0 : i32
    %41 = tpu.memref_slice %arg3[%40, %c0_i32_37] : memref<64x32xf32, #tpu.memory_space<any>> -> memref<1x32xf32, #tpu.memory_space<any>>
    %c4_i32_38 = arith.constant 4 : i32
    %c0_i32_39 = arith.constant 0 : i32
    %42 = tpu.memref_slice %arg8[%c4_i32_38, %c0_i32_39] : memref<16x32xf32, #tpu.memory_space<vmem>> -> memref<1x32xf32, #tpu.memory_space<vmem>>
    %43 = tpu.memref_slice %arg9[%c0_i32_36, %c4_i32] : memref<2x8x!tpu.dma_semaphore, #tpu.memory_space<semaphore_mem>> -> memref<1x1x!tpu.dma_semaphore, #tpu.memory_space<semaphore_mem>>
    %44 = tpu.memref_squeeze %43 : memref<1x1x!tpu.dma_semaphore, #tpu.memory_space<semaphore_mem>> -> memref<!tpu.dma_semaphore, #tpu.memory_space<semaphore_mem>>
    tpu.enqueue_dma source(%41 : memref<1x32xf32, #tpu.memory_space<any>>) target(%42 : memref<1x32xf32, #tpu.memory_space<vmem>>) target_semaphore(%44 : memref<!tpu.dma_semaphore, #tpu.memory_space<semaphore_mem>>)
    %c4_40 = arith.constant 4 : index
    %45 = memref.load %arg2[%c4_40] : memref<8xi32, #tpu.memory_space<smem>>
    %c1_i32_41 = arith.constant 1 : i32
    %c4_i32_42 = arith.constant 4 : i32
    %c0_i32_43 = arith.constant 0 : i32
    %46 = tpu.memref_slice %arg4[%45, %c0_i32_43] : memref<128x32xf32, #tpu.memory_space<any>> -> memref<1x32xf32, #tpu.memory_space<any>>
    %c12_i32 = arith.constant 12 : i32
    %c0_i32_44 = arith.constant 0 : i32
    %47 = tpu.memref_slice %arg8[%c12_i32, %c0_i32_44] : memref<16x32xf32, #tpu.memory_space<vmem>> -> memref<1x32xf32, #tpu.memory_space<vmem>>
    %48 = tpu.memref_slice %arg9[%c1_i32_41, %c4_i32_42] : memref<2x8x!tpu.dma_semaphore, #tpu.memory_space<semaphore_mem>> -> memref<1x1x!tpu.dma_semaphore, #tpu.memory_space<semaphore_mem>>
    %49 = tpu.memref_squeeze %48 : memref<1x1x!tpu.dma_semaphore, #tpu.memory_space<semaphore_mem>> -> memref<!tpu.dma_semaphore, #tpu.memory_space<semaphore_mem>>
    tpu.enqueue_dma source(%46 : memref<1x32xf32, #tpu.memory_space<any>>) target(%47 : memref<1x32xf32, #tpu.memory_space<vmem>>) target_semaphore(%49 : memref<!tpu.dma_semaphore, #tpu.memory_space<semaphore_mem>>)
    %c5 = arith.constant 5 : index
    %50 = memref.load %arg1[%c5] : memref<8xi32, #tpu.memory_space<smem>>
    %c0_i32_45 = arith.constant 0 : i32
    %c5_i32 = arith.constant 5 : i32
    %c0_i32_46 = arith.constant 0 : i32
    %51 = tpu.memref_slice %arg3[%50, %c0_i32_46] : memref<64x32xf32, #tpu.memory_space<any>> -> memref<1x32xf32, #tpu.memory_space<any>>
    %c5_i32_47 = arith.constant 5 : i32
    %c0_i32_48 = arith.constant 0 : i32
    %52 = tpu.memref_slice %arg8[%c5_i32_47, %c0_i32_48] : memref<16x32xf32, #tpu.memory_space<vmem>> -> memref<1x32xf32, #tpu.memory_space<vmem>>
    %53 = tpu.memref_slice %arg9[%c0_i32_45, %c5_i32] : memref<2x8x!tpu.dma_semaphore, #tpu.memory_space<semaphore_mem>> -> memref<1x1x!tpu.dma_semaphore, #tpu.memory_space<semaphore_mem>>
    %54 = tpu.memref_squeeze %53 : memref<1x1x!tpu.dma_semaphore, #tpu.memory_space<semaphore_mem>> -> memref<!tpu.dma_semaphore, #tpu.memory_space<semaphore_mem>>
    tpu.enqueue_dma source(%51 : memref<1x32xf32, #tpu.memory_space<any>>) target(%52 : memref<1x32xf32, #tpu.memory_space<vmem>>) target_semaphore(%54 : memref<!tpu.dma_semaphore, #tpu.memory_space<semaphore_mem>>)
    %c5_49 = arith.constant 5 : index
    %55 = memref.load %arg2[%c5_49] : memref<8xi32, #tpu.memory_space<smem>>
    %c1_i32_50 = arith.constant 1 : i32
    %c5_i32_51 = arith.constant 5 : i32
    %c0_i32_52 = arith.constant 0 : i32
    %56 = tpu.memref_slice %arg4[%55, %c0_i32_52] : memref<128x32xf32, #tpu.memory_space<any>> -> memref<1x32xf32, #tpu.memory_space<any>>
    %c13_i32 = arith.constant 13 : i32
    %c0_i32_53 = arith.constant 0 : i32
    %57 = tpu.memref_slice %arg8[%c13_i32, %c0_i32_53] : memref<16x32xf32, #tpu.memory_space<vmem>> -> memref<1x32xf32, #tpu.memory_space<vmem>>
    %58 = tpu.memref_slice %arg9[%c1_i32_50, %c5_i32_51] : memref<2x8x!tpu.dma_semaphore, #tpu.memory_space<semaphore_mem>> -> memref<1x1x!tpu.dma_semaphore, #tpu.memory_space<semaphore_mem>>
    %59 = tpu.memref_squeeze %58 : memref<1x1x!tpu.dma_semaphore, #tpu.memory_space<semaphore_mem>> -> memref<!tpu.dma_semaphore, #tpu.memory_space<semaphore_mem>>
    tpu.enqueue_dma source(%56 : memref<1x32xf32, #tpu.memory_space<any>>) target(%57 : memref<1x32xf32, #tpu.memory_space<vmem>>) target_semaphore(%59 : memref<!tpu.dma_semaphore, #tpu.memory_space<semaphore_mem>>)
    %c6 = arith.constant 6 : index
    %60 = memref.load %arg1[%c6] : memref<8xi32, #tpu.memory_space<smem>>
    %c0_i32_54 = arith.constant 0 : i32
    %c6_i32 = arith.constant 6 : i32
    %c0_i32_55 = arith.constant 0 : i32
    %61 = tpu.memref_slice %arg3[%60, %c0_i32_55] : memref<64x32xf32, #tpu.memory_space<any>> -> memref<1x32xf32, #tpu.memory_space<any>>
    %c6_i32_56 = arith.constant 6 : i32
    %c0_i32_57 = arith.constant 0 : i32
    %62 = tpu.memref_slice %arg8[%c6_i32_56, %c0_i32_57] : memref<16x32xf32, #tpu.memory_space<vmem>> -> memref<1x32xf32, #tpu.memory_space<vmem>>
    %63 = tpu.memref_slice %arg9[%c0_i32_54, %c6_i32] : memref<2x8x!tpu.dma_semaphore, #tpu.memory_space<semaphore_mem>> -> memref<1x1x!tpu.dma_semaphore, #tpu.memory_space<semaphore_mem>>
    %64 = tpu.memref_squeeze %63 : memref<1x1x!tpu.dma_semaphore, #tpu.memory_space<semaphore_mem>> -> memref<!tpu.dma_semaphore, #tpu.memory_space<semaphore_mem>>
    tpu.enqueue_dma source(%61 : memref<1x32xf32, #tpu.memory_space<any>>) target(%62 : memref<1x32xf32, #tpu.memory_space<vmem>>) target_semaphore(%64 : memref<!tpu.dma_semaphore, #tpu.memory_space<semaphore_mem>>)
    %c6_58 = arith.constant 6 : index
    %65 = memref.load %arg2[%c6_58] : memref<8xi32, #tpu.memory_space<smem>>
    %c1_i32_59 = arith.constant 1 : i32
    %c6_i32_60 = arith.constant 6 : i32
    %c0_i32_61 = arith.constant 0 : i32
    %66 = tpu.memref_slice %arg4[%65, %c0_i32_61] : memref<128x32xf32, #tpu.memory_space<any>> -> memref<1x32xf32, #tpu.memory_space<any>>
    %c14_i32 = arith.constant 14 : i32
    %c0_i32_62 = arith.constant 0 : i32
    %67 = tpu.memref_slice %arg8[%c14_i32, %c0_i32_62] : memref<16x32xf32, #tpu.memory_space<vmem>> -> memref<1x32xf32, #tpu.memory_space<vmem>>
    %68 = tpu.memref_slice %arg9[%c1_i32_59, %c6_i32_60] : memref<2x8x!tpu.dma_semaphore, #tpu.memory_space<semaphore_mem>> -> memref<1x1x!tpu.dma_semaphore, #tpu.memory_space<semaphore_mem>>
    %69 = tpu.memref_squeeze %68 : memref<1x1x!tpu.dma_semaphore, #tpu.memory_space<semaphore_mem>> -> memref<!tpu.dma_semaphore, #tpu.memory_space<semaphore_mem>>
    tpu.enqueue_dma source(%66 : memref<1x32xf32, #tpu.memory_space<any>>) target(%67 : memref<1x32xf32, #tpu.memory_space<vmem>>) target_semaphore(%69 : memref<!tpu.dma_semaphore, #tpu.memory_space<semaphore_mem>>)
    %c7 = arith.constant 7 : index
    %70 = memref.load %arg1[%c7] : memref<8xi32, #tpu.memory_space<smem>>
    %c0_i32_63 = arith.constant 0 : i32
    %c7_i32 = arith.constant 7 : i32
    %c0_i32_64 = arith.constant 0 : i32
    %71 = tpu.memref_slice %arg3[%70, %c0_i32_64] : memref<64x32xf32, #tpu.memory_space<any>> -> memref<1x32xf32, #tpu.memory_space<any>>
    %c7_i32_65 = arith.constant 7 : i32
    %c0_i32_66 = arith.constant 0 : i32
    %72 = tpu.memref_slice %arg8[%c7_i32_65, %c0_i32_66] : memref<16x32xf32, #tpu.memory_space<vmem>> -> memref<1x32xf32, #tpu.memory_space<vmem>>
    %73 = tpu.memref_slice %arg9[%c0_i32_63, %c7_i32] : memref<2x8x!tpu.dma_semaphore, #tpu.memory_space<semaphore_mem>> -> memref<1x1x!tpu.dma_semaphore, #tpu.memory_space<semaphore_mem>>
    %74 = tpu.memref_squeeze %73 : memref<1x1x!tpu.dma_semaphore, #tpu.memory_space<semaphore_mem>> -> memref<!tpu.dma_semaphore, #tpu.memory_space<semaphore_mem>>
    tpu.enqueue_dma source(%71 : memref<1x32xf32, #tpu.memory_space<any>>) target(%72 : memref<1x32xf32, #tpu.memory_space<vmem>>) target_semaphore(%74 : memref<!tpu.dma_semaphore, #tpu.memory_space<semaphore_mem>>)
    %c7_67 = arith.constant 7 : index
    %75 = memref.load %arg2[%c7_67] : memref<8xi32, #tpu.memory_space<smem>>
    %c1_i32_68 = arith.constant 1 : i32
    %c7_i32_69 = arith.constant 7 : i32
    %c0_i32_70 = arith.constant 0 : i32
    %76 = tpu.memref_slice %arg4[%75, %c0_i32_70] : memref<128x32xf32, #tpu.memory_space<any>> -> memref<1x32xf32, #tpu.memory_space<any>>
    %c15_i32 = arith.constant 15 : i32
    %c0_i32_71 = arith.constant 0 : i32
    %77 = tpu.memref_slice %arg8[%c15_i32, %c0_i32_71] : memref<16x32xf32, #tpu.memory_space<vmem>> -> memref<1x32xf32, #tpu.memory_space<vmem>>
    %78 = tpu.memref_slice %arg9[%c1_i32_68, %c7_i32_69] : memref<2x8x!tpu.dma_semaphore, #tpu.memory_space<semaphore_mem>> -> memref<1x1x!tpu.dma_semaphore, #tpu.memory_space<semaphore_mem>>
    %79 = tpu.memref_squeeze %78 : memref<1x1x!tpu.dma_semaphore, #tpu.memory_space<semaphore_mem>> -> memref<!tpu.dma_semaphore, #tpu.memory_space<semaphore_mem>>
    tpu.enqueue_dma source(%76 : memref<1x32xf32, #tpu.memory_space<any>>) target(%77 : memref<1x32xf32, #tpu.memory_space<vmem>>) target_semaphore(%79 : memref<!tpu.dma_semaphore, #tpu.memory_space<semaphore_mem>>)
    %c0_i32_72 = arith.constant 0 : i32
    %c0_i32_73 = arith.constant 0 : i32
    %c0_i32_74 = arith.constant 0 : i32
    %80 = tpu.memref_slice %arg3[%0, %c0_i32_74] : memref<64x32xf32, #tpu.memory_space<any>> -> memref<1x32xf32, #tpu.memory_space<any>>
    %c0_i32_75 = arith.constant 0 : i32
    %c0_i32_76 = arith.constant 0 : i32
    %81 = tpu.memref_slice %arg8[%c0_i32_75, %c0_i32_76] : memref<16x32xf32, #tpu.memory_space<vmem>> -> memref<1x32xf32, #tpu.memory_space<vmem>>
    %82 = tpu.memref_slice %arg9[%c0_i32_72, %c0_i32_73] : memref<2x8x!tpu.dma_semaphore, #tpu.memory_space<semaphore_mem>> -> memref<1x1x!tpu.dma_semaphore, #tpu.memory_space<semaphore_mem>>
    %83 = tpu.memref_squeeze %82 : memref<1x1x!tpu.dma_semaphore, #tpu.memory_space<semaphore_mem>> -> memref<!tpu.dma_semaphore, #tpu.memory_space<semaphore_mem>>
    tpu.wait_dma2 semaphore(%83 : memref<!tpu.dma_semaphore, #tpu.memory_space<semaphore_mem>>) src(%80 : memref<1x32xf32, #tpu.memory_space<any>>) dst(%81 : memref<1x32xf32, #tpu.memory_space<vmem>>)
    %c1_i32_77 = arith.constant 1 : i32
    %c0_i32_78 = arith.constant 0 : i32
    %c0_i32_79 = arith.constant 0 : i32
    %84 = tpu.memref_slice %arg4[%5, %c0_i32_79] : memref<128x32xf32, #tpu.memory_space<any>> -> memref<1x32xf32, #tpu.memory_space<any>>
    %c8_i32_80 = arith.constant 8 : i32
    %c0_i32_81 = arith.constant 0 : i32
    %85 = tpu.memref_slice %arg8[%c8_i32_80, %c0_i32_81] : memref<16x32xf32, #tpu.memory_space<vmem>> -> memref<1x32xf32, #tpu.memory_space<vmem>>
    %86 = tpu.memref_slice %arg9[%c1_i32_77, %c0_i32_78] : memref<2x8x!tpu.dma_semaphore, #tpu.memory_space<semaphore_mem>> -> memref<1x1x!tpu.dma_semaphore, #tpu.memory_space<semaphore_mem>>
    %87 = tpu.memref_squeeze %86 : memref<1x1x!tpu.dma_semaphore, #tpu.memory_space<semaphore_mem>> -> memref<!tpu.dma_semaphore, #tpu.memory_space<semaphore_mem>>
    tpu.wait_dma2 semaphore(%87 : memref<!tpu.dma_semaphore, #tpu.memory_space<semaphore_mem>>) src(%84 : memref<1x32xf32, #tpu.memory_space<any>>) dst(%85 : memref<1x32xf32, #tpu.memory_space<vmem>>)
    %c0_i32_82 = arith.constant 0 : i32
    %c1_i32_83 = arith.constant 1 : i32
    %c0_i32_84 = arith.constant 0 : i32
    %88 = tpu.memref_slice %arg3[%10, %c0_i32_84] : memref<64x32xf32, #tpu.memory_space<any>> -> memref<1x32xf32, #tpu.memory_space<any>>
    %c1_i32_85 = arith.constant 1 : i32
    %c0_i32_86 = arith.constant 0 : i32
    %89 = tpu.memref_slice %arg8[%c1_i32_85, %c0_i32_86] : memref<16x32xf32, #tpu.memory_space<vmem>> -> memref<1x32xf32, #tpu.memory_space<vmem>>
    %90 = tpu.memref_slice %arg9[%c0_i32_82, %c1_i32_83] : memref<2x8x!tpu.dma_semaphore, #tpu.memory_space<semaphore_mem>> -> memref<1x1x!tpu.dma_semaphore, #tpu.memory_space<semaphore_mem>>
    %91 = tpu.memref_squeeze %90 : memref<1x1x!tpu.dma_semaphore, #tpu.memory_space<semaphore_mem>> -> memref<!tpu.dma_semaphore, #tpu.memory_space<semaphore_mem>>
    tpu.wait_dma2 semaphore(%91 : memref<!tpu.dma_semaphore, #tpu.memory_space<semaphore_mem>>) src(%88 : memref<1x32xf32, #tpu.memory_space<any>>) dst(%89 : memref<1x32xf32, #tpu.memory_space<vmem>>)
    %c1_i32_87 = arith.constant 1 : i32
    %c1_i32_88 = arith.constant 1 : i32
    %c0_i32_89 = arith.constant 0 : i32
    %92 = tpu.memref_slice %arg4[%15, %c0_i32_89] : memref<128x32xf32, #tpu.memory_space<any>> -> memref<1x32xf32, #tpu.memory_space<any>>
    %c9_i32_90 = arith.constant 9 : i32
    %c0_i32_91 = arith.constant 0 : i32
    %93 = tpu.memref_slice %arg8[%c9_i32_90, %c0_i32_91] : memref<16x32xf32, #tpu.memory_space<vmem>> -> memref<1x32xf32, #tpu.memory_space<vmem>>
    %94 = tpu.memref_slice %arg9[%c1_i32_87, %c1_i32_88] : memref<2x8x!tpu.dma_semaphore, #tpu.memory_space<semaphore_mem>> -> memref<1x1x!tpu.dma_semaphore, #tpu.memory_space<semaphore_mem>>
    %95 = tpu.memref_squeeze %94 : memref<1x1x!tpu.dma_semaphore, #tpu.memory_space<semaphore_mem>> -> memref<!tpu.dma_semaphore, #tpu.memory_space<semaphore_mem>>
    tpu.wait_dma2 semaphore(%95 : memref<!tpu.dma_semaphore, #tpu.memory_space<semaphore_mem>>) src(%92 : memref<1x32xf32, #tpu.memory_space<any>>) dst(%93 : memref<1x32xf32, #tpu.memory_space<vmem>>)
    %c0_i32_92 = arith.constant 0 : i32
    %c2_i32_93 = arith.constant 2 : i32
    %c0_i32_94 = arith.constant 0 : i32
    %96 = tpu.memref_slice %arg3[%20, %c0_i32_94] : memref<64x32xf32, #tpu.memory_space<any>> -> memref<1x32xf32, #tpu.memory_space<any>>
    %c2_i32_95 = arith.constant 2 : i32
    %c0_i32_96 = arith.constant 0 : i32
    %97 = tpu.memref_slice %arg8[%c2_i32_95, %c0_i32_96] : memref<16x32xf32, #tpu.memory_space<vmem>> -> memref<1x32xf32, #tpu.memory_space<vmem>>
    %98 = tpu.memref_slice %arg9[%c0_i32_92, %c2_i32_93] : memref<2x8x!tpu.dma_semaphore, #tpu.memory_space<semaphore_mem>> -> memref<1x1x!tpu.dma_semaphore, #tpu.memory_space<semaphore_mem>>
    %99 = tpu.memref_squeeze %98 : memref<1x1x!tpu.dma_semaphore, #tpu.memory_space<semaphore_mem>> -> memref<!tpu.dma_semaphore, #tpu.memory_space<semaphore_mem>>
    tpu.wait_dma2 semaphore(%99 : memref<!tpu.dma_semaphore, #tpu.memory_space<semaphore_mem>>) src(%96 : memref<1x32xf32, #tpu.memory_space<any>>) dst(%97 : memref<1x32xf32, #tpu.memory_space<vmem>>)
    %c1_i32_97 = arith.constant 1 : i32
    %c2_i32_98 = arith.constant 2 : i32
    %c0_i32_99 = arith.constant 0 : i32
    %100 = tpu.memref_slice %arg4[%25, %c0_i32_99] : memref<128x32xf32, #tpu.memory_space<any>> -> memref<1x32xf32, #tpu.memory_space<any>>
    %c10_i32_100 = arith.constant 10 : i32
    %c0_i32_101 = arith.constant 0 : i32
    %101 = tpu.memref_slice %arg8[%c10_i32_100, %c0_i32_101] : memref<16x32xf32, #tpu.memory_space<vmem>> -> memref<1x32xf32, #tpu.memory_space<vmem>>
    %102 = tpu.memref_slice %arg9[%c1_i32_97, %c2_i32_98] : memref<2x8x!tpu.dma_semaphore, #tpu.memory_space<semaphore_mem>> -> memref<1x1x!tpu.dma_semaphore, #tpu.memory_space<semaphore_mem>>
    %103 = tpu.memref_squeeze %102 : memref<1x1x!tpu.dma_semaphore, #tpu.memory_space<semaphore_mem>> -> memref<!tpu.dma_semaphore, #tpu.memory_space<semaphore_mem>>
    tpu.wait_dma2 semaphore(%103 : memref<!tpu.dma_semaphore, #tpu.memory_space<semaphore_mem>>) src(%100 : memref<1x32xf32, #tpu.memory_space<any>>) dst(%101 : memref<1x32xf32, #tpu.memory_space<vmem>>)
    %c0_i32_102 = arith.constant 0 : i32
    %c3_i32_103 = arith.constant 3 : i32
    %c0_i32_104 = arith.constant 0 : i32
    %104 = tpu.memref_slice %arg3[%30, %c0_i32_104] : memref<64x32xf32, #tpu.memory_space<any>> -> memref<1x32xf32, #tpu.memory_space<any>>
    %c3_i32_105 = arith.constant 3 : i32
    %c0_i32_106 = arith.constant 0 : i32
    %105 = tpu.memref_slice %arg8[%c3_i32_105, %c0_i32_106] : memref<16x32xf32, #tpu.memory_space<vmem>> -> memref<1x32xf32, #tpu.memory_space<vmem>>
    %106 = tpu.memref_slice %arg9[%c0_i32_102, %c3_i32_103] : memref<2x8x!tpu.dma_semaphore, #tpu.memory_space<semaphore_mem>> -> memref<1x1x!tpu.dma_semaphore, #tpu.memory_space<semaphore_mem>>
    %107 = tpu.memref_squeeze %106 : memref<1x1x!tpu.dma_semaphore, #tpu.memory_space<semaphore_mem>> -> memref<!tpu.dma_semaphore, #tpu.memory_space<semaphore_mem>>
    tpu.wait_dma2 semaphore(%107 : memref<!tpu.dma_semaphore, #tpu.memory_space<semaphore_mem>>) src(%104 : memref<1x32xf32, #tpu.memory_space<any>>) dst(%105 : memref<1x32xf32, #tpu.memory_space<vmem>>)
    %c1_i32_107 = arith.constant 1 : i32
    %c3_i32_108 = arith.constant 3 : i32
    %c0_i32_109 = arith.constant 0 : i32
    %108 = tpu.memref_slice %arg4[%35, %c0_i32_109] : memref<128x32xf32, #tpu.memory_space<any>> -> memref<1x32xf32, #tpu.memory_space<any>>
    %c11_i32_110 = arith.constant 11 : i32
    %c0_i32_111 = arith.constant 0 : i32
    %109 = tpu.memref_slice %arg8[%c11_i32_110, %c0_i32_111] : memref<16x32xf32, #tpu.memory_space<vmem>> -> memref<1x32xf32, #tpu.memory_space<vmem>>
    %110 = tpu.memref_slice %arg9[%c1_i32_107, %c3_i32_108] : memref<2x8x!tpu.dma_semaphore, #tpu.memory_space<semaphore_mem>> -> memref<1x1x!tpu.dma_semaphore, #tpu.memory_space<semaphore_mem>>
    %111 = tpu.memref_squeeze %110 : memref<1x1x!tpu.dma_semaphore, #tpu.memory_space<semaphore_mem>> -> memref<!tpu.dma_semaphore, #tpu.memory_space<semaphore_mem>>
    tpu.wait_dma2 semaphore(%111 : memref<!tpu.dma_semaphore, #tpu.memory_space<semaphore_mem>>) src(%108 : memref<1x32xf32, #tpu.memory_space<any>>) dst(%109 : memref<1x32xf32, #tpu.memory_space<vmem>>)
    %c0_i32_112 = arith.constant 0 : i32
    %c4_i32_113 = arith.constant 4 : i32
    %c0_i32_114 = arith.constant 0 : i32
    %112 = tpu.memref_slice %arg3[%40, %c0_i32_114] : memref<64x32xf32, #tpu.memory_space<any>> -> memref<1x32xf32, #tpu.memory_space<any>>
    %c4_i32_115 = arith.constant 4 : i32
    %c0_i32_116 = arith.constant 0 : i32
    %113 = tpu.memref_slice %arg8[%c4_i32_115, %c0_i32_116] : memref<16x32xf32, #tpu.memory_space<vmem>> -> memref<1x32xf32, #tpu.memory_space<vmem>>
    %114 = tpu.memref_slice %arg9[%c0_i32_112, %c4_i32_113] : memref<2x8x!tpu.dma_semaphore, #tpu.memory_space<semaphore_mem>> -> memref<1x1x!tpu.dma_semaphore, #tpu.memory_space<semaphore_mem>>
    %115 = tpu.memref_squeeze %114 : memref<1x1x!tpu.dma_semaphore, #tpu.memory_space<semaphore_mem>> -> memref<!tpu.dma_semaphore, #tpu.memory_space<semaphore_mem>>
    tpu.wait_dma2 semaphore(%115 : memref<!tpu.dma_semaphore, #tpu.memory_space<semaphore_mem>>) src(%112 : memref<1x32xf32, #tpu.memory_space<any>>) dst(%113 : memref<1x32xf32, #tpu.memory_space<vmem>>)
    %c1_i32_117 = arith.constant 1 : i32
    %c4_i32_118 = arith.constant 4 : i32
    %c0_i32_119 = arith.constant 0 : i32
    %116 = tpu.memref_slice %arg4[%45, %c0_i32_119] : memref<128x32xf32, #tpu.memory_space<any>> -> memref<1x32xf32, #tpu.memory_space<any>>
    %c12_i32_120 = arith.constant 12 : i32
    %c0_i32_121 = arith.constant 0 : i32
    %117 = tpu.memref_slice %arg8[%c12_i32_120, %c0_i32_121] : memref<16x32xf32, #tpu.memory_space<vmem>> -> memref<1x32xf32, #tpu.memory_space<vmem>>
    %118 = tpu.memref_slice %arg9[%c1_i32_117, %c4_i32_118] : memref<2x8x!tpu.dma_semaphore, #tpu.memory_space<semaphore_mem>> -> memref<1x1x!tpu.dma_semaphore, #tpu.memory_space<semaphore_mem>>
    %119 = tpu.memref_squeeze %118 : memref<1x1x!tpu.dma_semaphore, #tpu.memory_space<semaphore_mem>> -> memref<!tpu.dma_semaphore, #tpu.memory_space<semaphore_mem>>
    tpu.wait_dma2 semaphore(%119 : memref<!tpu.dma_semaphore, #tpu.memory_space<semaphore_mem>>) src(%116 : memref<1x32xf32, #tpu.memory_space<any>>) dst(%117 : memref<1x32xf32, #tpu.memory_space<vmem>>)
    %c0_i32_122 = arith.constant 0 : i32
    %c5_i32_123 = arith.constant 5 : i32
    %c0_i32_124 = arith.constant 0 : i32
    %120 = tpu.memref_slice %arg3[%50, %c0_i32_124] : memref<64x32xf32, #tpu.memory_space<any>> -> memref<1x32xf32, #tpu.memory_space<any>>
    %c5_i32_125 = arith.constant 5 : i32
    %c0_i32_126 = arith.constant 0 : i32
    %121 = tpu.memref_slice %arg8[%c5_i32_125, %c0_i32_126] : memref<16x32xf32, #tpu.memory_space<vmem>> -> memref<1x32xf32, #tpu.memory_space<vmem>>
    %122 = tpu.memref_slice %arg9[%c0_i32_122, %c5_i32_123] : memref<2x8x!tpu.dma_semaphore, #tpu.memory_space<semaphore_mem>> -> memref<1x1x!tpu.dma_semaphore, #tpu.memory_space<semaphore_mem>>
    %123 = tpu.memref_squeeze %122 : memref<1x1x!tpu.dma_semaphore, #tpu.memory_space<semaphore_mem>> -> memref<!tpu.dma_semaphore, #tpu.memory_space<semaphore_mem>>
    tpu.wait_dma2 semaphore(%123 : memref<!tpu.dma_semaphore, #tpu.memory_space<semaphore_mem>>) src(%120 : memref<1x32xf32, #tpu.memory_space<any>>) dst(%121 : memref<1x32xf32, #tpu.memory_space<vmem>>)
    %c1_i32_127 = arith.constant 1 : i32
    %c5_i32_128 = arith.constant 5 : i32
    %c0_i32_129 = arith.constant 0 : i32
    %124 = tpu.memref_slice %arg4[%55, %c0_i32_129] : memref<128x32xf32, #tpu.memory_space<any>> -> memref<1x32xf32, #tpu.memory_space<any>>
    %c13_i32_130 = arith.constant 13 : i32
    %c0_i32_131 = arith.constant 0 : i32
    %125 = tpu.memref_slice %arg8[%c13_i32_130, %c0_i32_131] : memref<16x32xf32, #tpu.memory_space<vmem>> -> memref<1x32xf32, #tpu.memory_space<vmem>>
    %126 = tpu.memref_slice %arg9[%c1_i32_127, %c5_i32_128] : memref<2x8x!tpu.dma_semaphore, #tpu.memory_space<semaphore_mem>> -> memref<1x1x!tpu.dma_semaphore, #tpu.memory_space<semaphore_mem>>
    %127 = tpu.memref_squeeze %126 : memref<1x1x!tpu.dma_semaphore, #tpu.memory_space<semaphore_mem>> -> memref<!tpu.dma_semaphore, #tpu.memory_space<semaphore_mem>>
    tpu.wait_dma2 semaphore(%127 : memref<!tpu.dma_semaphore, #tpu.memory_space<semaphore_mem>>) src(%124 : memref<1x32xf32, #tpu.memory_space<any>>) dst(%125 : memref<1x32xf32, #tpu.memory_space<vmem>>)
    %c0_i32_132 = arith.constant 0 : i32
    %c6_i32_133 = arith.constant 6 : i32
    %c0_i32_134 = arith.constant 0 : i32
    %128 = tpu.memref_slice %arg3[%60, %c0_i32_134] : memref<64x32xf32, #tpu.memory_space<any>> -> memref<1x32xf32, #tpu.memory_space<any>>
    %c6_i32_135 = arith.constant 6 : i32
    %c0_i32_136 = arith.constant 0 : i32
    %129 = tpu.memref_slice %arg8[%c6_i32_135, %c0_i32_136] : memref<16x32xf32, #tpu.memory_space<vmem>> -> memref<1x32xf32, #tpu.memory_space<vmem>>
    %130 = tpu.memref_slice %arg9[%c0_i32_132, %c6_i32_133] : memref<2x8x!tpu.dma_semaphore, #tpu.memory_space<semaphore_mem>> -> memref<1x1x!tpu.dma_semaphore, #tpu.memory_space<semaphore_mem>>
    %131 = tpu.memref_squeeze %130 : memref<1x1x!tpu.dma_semaphore, #tpu.memory_space<semaphore_mem>> -> memref<!tpu.dma_semaphore, #tpu.memory_space<semaphore_mem>>
    tpu.wait_dma2 semaphore(%131 : memref<!tpu.dma_semaphore, #tpu.memory_space<semaphore_mem>>) src(%128 : memref<1x32xf32, #tpu.memory_space<any>>) dst(%129 : memref<1x32xf32, #tpu.memory_space<vmem>>)
    %c1_i32_137 = arith.constant 1 : i32
    %c6_i32_138 = arith.constant 6 : i32
    %c0_i32_139 = arith.constant 0 : i32
    %132 = tpu.memref_slice %arg4[%65, %c0_i32_139] : memref<128x32xf32, #tpu.memory_space<any>> -> memref<1x32xf32, #tpu.memory_space<any>>
    %c14_i32_140 = arith.constant 14 : i32
    %c0_i32_141 = arith.constant 0 : i32
    %133 = tpu.memref_slice %arg8[%c14_i32_140, %c0_i32_141] : memref<16x32xf32, #tpu.memory_space<vmem>> -> memref<1x32xf32, #tpu.memory_space<vmem>>
    %134 = tpu.memref_slice %arg9[%c1_i32_137, %c6_i32_138] : memref<2x8x!tpu.dma_semaphore, #tpu.memory_space<semaphore_mem>> -> memref<1x1x!tpu.dma_semaphore, #tpu.memory_space<semaphore_mem>>
    %135 = tpu.memref_squeeze %134 : memref<1x1x!tpu.dma_semaphore, #tpu.memory_space<semaphore_mem>> -> memref<!tpu.dma_semaphore, #tpu.memory_space<semaphore_mem>>
    tpu.wait_dma2 semaphore(%135 : memref<!tpu.dma_semaphore, #tpu.memory_space<semaphore_mem>>) src(%132 : memref<1x32xf32, #tpu.memory_space<any>>) dst(%133 : memref<1x32xf32, #tpu.memory_space<vmem>>)
    %c0_i32_142 = arith.constant 0 : i32
    %c7_i32_143 = arith.constant 7 : i32
    %c0_i32_144 = arith.constant 0 : i32
    %136 = tpu.memref_slice %arg3[%70, %c0_i32_144] : memref<64x32xf32, #tpu.memory_space<any>> -> memref<1x32xf32, #tpu.memory_space<any>>
    %c7_i32_145 = arith.constant 7 : i32
    %c0_i32_146 = arith.constant 0 : i32
    %137 = tpu.memref_slice %arg8[%c7_i32_145, %c0_i32_146] : memref<16x32xf32, #tpu.memory_space<vmem>> -> memref<1x32xf32, #tpu.memory_space<vmem>>
    %138 = tpu.memref_slice %arg9[%c0_i32_142, %c7_i32_143] : memref<2x8x!tpu.dma_semaphore, #tpu.memory_space<semaphore_mem>> -> memref<1x1x!tpu.dma_semaphore, #tpu.memory_space<semaphore_mem>>
    %139 = tpu.memref_squeeze %138 : memref<1x1x!tpu.dma_semaphore, #tpu.memory_space<semaphore_mem>> -> memref<!tpu.dma_semaphore, #tpu.memory_space<semaphore_mem>>
    tpu.wait_dma2 semaphore(%139 : memref<!tpu.dma_semaphore, #tpu.memory_space<semaphore_mem>>) src(%136 : memref<1x32xf32, #tpu.memory_space<any>>) dst(%137 : memref<1x32xf32, #tpu.memory_space<vmem>>)
    %c1_i32_147 = arith.constant 1 : i32
    %c7_i32_148 = arith.constant 7 : i32
    %c0_i32_149 = arith.constant 0 : i32
    %140 = tpu.memref_slice %arg4[%75, %c0_i32_149] : memref<128x32xf32, #tpu.memory_space<any>> -> memref<1x32xf32, #tpu.memory_space<any>>
    %c15_i32_150 = arith.constant 15 : i32
    %c0_i32_151 = arith.constant 0 : i32
    %141 = tpu.memref_slice %arg8[%c15_i32_150, %c0_i32_151] : memref<16x32xf32, #tpu.memory_space<vmem>> -> memref<1x32xf32, #tpu.memory_space<vmem>>
    %142 = tpu.memref_slice %arg9[%c1_i32_147, %c7_i32_148] : memref<2x8x!tpu.dma_semaphore, #tpu.memory_space<semaphore_mem>> -> memref<1x1x!tpu.dma_semaphore, #tpu.memory_space<semaphore_mem>>
    %143 = tpu.memref_squeeze %142 : memref<1x1x!tpu.dma_semaphore, #tpu.memory_space<semaphore_mem>> -> memref<!tpu.dma_semaphore, #tpu.memory_space<semaphore_mem>>
    tpu.wait_dma2 semaphore(%143 : memref<!tpu.dma_semaphore, #tpu.memory_space<semaphore_mem>>) src(%140 : memref<1x32xf32, #tpu.memory_space<any>>) dst(%141 : memref<1x32xf32, #tpu.memory_space<vmem>>)
    %c0_152 = arith.constant 0 : index
    %c0_153 = arith.constant 0 : index
    %144 = vector.load %arg8[%c0_152, %c0_153] : memref<16x32xf32, #tpu.memory_space<vmem>>, vector<16x32xf32>
    %c0_154 = arith.constant 0 : index
    %c0_155 = arith.constant 0 : index
    %145 = vector.load %arg5[%c0_154, %c0_155] : memref<128x32xf32, #tpu.memory_space<vmem>>, vector<128x32xf32>
    %cst = arith.constant dense<0.000000e+00> : vector<16x128xf32>
    %146 = tpu.matmul %144, %145, %cst {dimension_numbers = #tpu.dot_dimension_numbers<[1], [1], [0], [0], [0, 0, 1, 0], [], []>} : vector<16x32xf32>, vector<128x32xf32>, vector<16x128xf32> -> vector<16x128xf32>
    %c0_156 = arith.constant 0 : index
    %c0_157 = arith.constant 0 : index
    %147 = vector.load %arg6[%c0_156, %c0_157] : memref<1x128xf32, #tpu.memory_space<vmem>>, vector<1x128xf32>
    %148 = vector.broadcast %147 : vector<1x128xf32> to vector<16x128xf32>
    %149 = arith.addf %146, %148 : vector<16x128xf32>
    %c0_158 = arith.constant 0 : index
    %c0_159 = arith.constant 0 : index
    %150 = vector.load %arg7[%c0_158, %c0_159] : memref<16x128xf32, #tpu.memory_space<vmem>>, vector<16x128xf32>
    tpu.vector_store %arg7[%c0_158, %c0_159], %149 {strides = array<i32>} : memref<16x128xf32, #tpu.memory_space<vmem>>, vector<16x128xf32>,
    return
  }
  func.func @transform_2(%arg0: i32, %arg1: memref<8xi32, #tpu.memory_space<smem>>, %arg2: memref<8xi32, #tpu.memory_space<smem>>) -> (i32, i32) {
    %c0_i32 = arith.constant 0 : i32
    %c0_i32_0 = arith.constant 0 : i32
    %c0_i32_1 = arith.constant 0 : i32
    return %c0_i32, %c0_i32_0 : i32, i32
  }
  func.func @transform_3(%arg0: i32, %arg1: memref<8xi32, #tpu.memory_space<smem>>, %arg2: memref<8xi32, #tpu.memory_space<smem>>) -> (i32, i32) {
    %c0_i32 = arith.constant 0 : i32
    %c0_i32_0 = arith.constant 0 : i32
    %c0_i32_1 = arith.constant 0 : i32
    return %c0_i32, %c0_i32_0 : i32, i32
  }
  func.func @transform_4(%arg0: i32, %arg1: memref<8xi32, #tpu.memory_space<smem>>, %arg2: memref<8xi32, #tpu.memory_space<smem>>) -> (i32, i32) {
    %c0_i32 = arith.constant 0 : i32
    %c0_i32_0 = arith.constant 0 : i32
    %c0_i32_1 = arith.constant 0 : i32
    return %c0_i32, %c0_i32_0 : i32, i32
  }
}

</mosaic_0001>

<bundles_post_ra>
// kernel: buir_forward.1
= control target key start
LH: loop header
LB: loop body
LE: loop exit
PB: predicated region body
PF: predicated region fallthrough
CT: control target
= control target key end

     0   :  { %s1685_s0 = inlined_call_operand.vmem [shape: s32[8], index: 0, kind: input, shape index: {}]   ;;  %s1686_s2 = inlined_call_operand.vmem [shape: f32[64,32], index: 2, kind: input, shape index: {}]   ;;  %s1687_s3 = inlined_call_operand.vmem [shape: f32[128,32], index: 3, kind: input, shape index: {}]   ;;  %s1688_s4 = inlined_call_operand.vmem [shape: f32[128,32], index: 4, kind: input, shape index: {}]   ;;  %s1689_s5 = inlined_call_operand.vmem [shape: f32[1,128], index: 5, kind: input, shape index: {}]   ;;  %s1690_s6 = inlined_call_operand.vmem [shape: f32[16,128], index: 6, kind: output, shape index: {}]   ;;  %s1691_s1 = inlined_call_operand.vmem [shape: s32[8], index: 1, kind: input, shape index: {}]  }
   0x1   :  { %s11_s23 = sshll.u32 %s1685_s0, 4  ;;  %s15_s26 = sshll.u32 %s1691_s1, 4  ;;  %s12_s23 = int_to_ptr.vmem [resolvable:$true] %s11_s23  ;;  %s16_s26 = int_to_ptr.vmem [resolvable:$true] %s15_s26 }
   0x2   :  { %s1439_s27 = scalar_lea.vmem %s12_s23, 16  ;;  %p1444_p1 = scmp.lt.s32.totalorder %s12_s23, %s12_s23 }
   0x3   :  { %p1440_p0 = scmp.ne.s32.totalorder %s12_s23, %s1439_s27  ;;  %p1445_p2 = scmp.lt.s32.totalorder %s1439_s27, %s1439_s27 }
   0x5   :  { %p1446_p3 = por %p1445_p2, %p1444_p1 }
   0x7   :  { %p1447_p4 = pnand %p1446_p3, %p1440_p0 }
   0x9   :  { %1450 = shalt.err (!%p1447_p4)  }
   0xa   :  { %s1497_s28 = smov [#allocation5]   ;;  %s1451_s29 = scalar_lea.vmem %s16_s26, 16 }
   0xb   :  { %14 = dma.vmem_to_smem %s12_s23, 16, %s1497_s28, [#allocation4] }
   0xc   :  { %p1452_p5 = scmp.ne.s32.totalorder %s16_s26, %s1451_s29  ;;  %p1456_p6 = scmp.lt.s32.totalorder %s16_s26, %s16_s26 }
   0xd   :  { %p1457_p7 = scmp.lt.s32.totalorder %s1451_s29, %s1451_s29 }
   0xf   :  { %p1458_p8 = por %p1457_p7, %p1456_p6 }
  0x11   :  { %p1459_p9 = pnand %p1458_p8, %p1452_p5 }
  0x13   :  { %1462 = shalt.err (!%p1459_p9)  }
  0x14   :  { %s1498_s0 = smov [#allocation6]  }
  0x15   :  { %18 = dma.vmem_to_smem %s16_s26, 16, %s1498_s0, [#allocation4] }
  0x16   :  { %1463 = dma.done.wait [#allocation4], 32 }
  0x17   :  { %1464 = vsyncadd [#allocation4], 4294967264 }
  0x18   :  { %20 = sfence }
  0x19   :  { %s25_s1 = sld [smem:[#allocation5]] }
  0x1f   :  { %s26_s8 = scalar_lea.vmem %s1686_s2, %s25_s1 }
  0x20   :  { %v44_v0 = vld [vmem:[%s26_s8] sm:$0x1] }
  0x21   :  { %45 = vst [vmem:[#allocation2] sm:$0x1] %v44_v0 }
  0x22   :  { %70 = vsyncadd [#allocation3], 16  ;;  %s71_s9 = sld [smem:[#allocation6]] }
  0x28   :  { %s72_s12 = scalar_lea.vmem %s1687_s3, %s71_s9 }
  0x29   :  { %v92_v1 = vld [vmem:[%s72_s12] sm:$0x1] }
  0x2a   :  { %93 = vst [vmem:[#allocation2 + $0x8] sm:$0x1] %v92_v1 }
  0x2b   :  { %118 = vsyncadd [#allocation3 + $0x8], 16  ;;  %s1287_s13 = sld [smem:[#allocation5 + $0x1]] }
  0x31   :  { %s120_s16 = scalar_lea.vmem %s1686_s2, %s1287_s13 }
  0x32   :  { %v140_v2 = vld [vmem:[%s120_s16] sm:$0x1] }
  0x33   :  { %141 = vst [vmem:[#allocation2 + $0x1] sm:$0x1] %v140_v2 }
  0x34   :  { %166 = vsyncadd [#allocation3 + $0x1], 16  ;;  %s1288_s17 = sld [smem:[#allocation6 + $0x1]] }
  0x3a   :  { %s168_s20 = scalar_lea.vmem %s1687_s3, %s1288_s17 }
  0x3b   :  { %v188_v3 = vld [vmem:[%s168_s20] sm:$0x1] }
  0x3c   :  { %189 = vst [vmem:[#allocation2 + $0x9] sm:$0x1] %v188_v3 }
  0x3d   :  { %214 = vsyncadd [#allocation3 + $0x9], 16  ;;  %s1289_s21 = sld [smem:[#allocation5 + $0x2]] }
  0x43   :  { %s216_s24 = scalar_lea.vmem %s1686_s2, %s1289_s21 }
  0x44   :  { %v236_v4 = vld [vmem:[%s216_s24] sm:$0x1] }
  0x45   :  { %237 = vst [vmem:[#allocation2 + $0x2] sm:$0x1] %v236_v4 }
  0x46   :  { %262 = vsyncadd [#allocation3 + $0x2], 16  ;;  %s1290_s25 = sld [smem:[#allocation6 + $0x2]] }
  0x4c   :  { %s264_s28 = scalar_lea.vmem %s1687_s3, %s1290_s25 }
  0x4d   :  { %v284_v5 = vld [vmem:[%s264_s28] sm:$0x1] }
  0x4e   :  { %285 = vst [vmem:[#allocation2 + $0xa] sm:$0x1] %v284_v5 }
  0x4f   :  { %310 = vsyncadd [#allocation3 + $0xa], 16  ;;  %s1291_s29 = sld [smem:[#allocation5 + $0x3]] }
  0x55   :  { %s312_s30 = scalar_lea.vmem %s1686_s2, %s1291_s29 }
  0x56   :  { %v332_v6 = vld [vmem:[%s312_s30] sm:$0x1] }
  0x57   :  { %333 = vst [vmem:[#allocation2 + $0x3] sm:$0x1] %v332_v6 }
  0x58   :  { %358 = vsyncadd [#allocation3 + $0x3], 16  ;;  %s1292_s7 = sld [smem:[#allocation6 + $0x3]] }
  0x5e   :  { %s360_s10 = scalar_lea.vmem %s1687_s3, %s1292_s7 }
  0x5f   :  { %v380_v7 = vld [vmem:[%s360_s10] sm:$0x1] }
  0x60   :  { %381 = vst [vmem:[#allocation2 + $0xb] sm:$0x1] %v380_v7 }
  0x61   :  { %406 = vsyncadd [#allocation3 + $0xb], 16  ;;  %s1293_s11 = sld [smem:[#allocation5 + $0x4]] }
  0x67   :  { %s408_s14 = scalar_lea.vmem %s1686_s2, %s1293_s11 }
  0x68   :  { %v428_v8 = vld [vmem:[%s408_s14] sm:$0x1] }
  0x69   :  { %429 = vst [vmem:[#allocation2 + $0x4] sm:$0x1] %v428_v8 }
  0x6a   :  { %454 = vsyncadd [#allocation3 + $0x4], 16  ;;  %s1294_s15 = sld [smem:[#allocation6 + $0x4]] }
  0x70   :  { %s456_s18 = scalar_lea.vmem %s1687_s3, %s1294_s15 }
  0x71   :  { %v476_v9 = vld [vmem:[%s456_s18] sm:$0x1] }
  0x72   :  { %477 = vst [vmem:[#allocation2 + $0xc] sm:$0x1] %v476_v9 }
  0x73   :  { %502 = vsyncadd [#allocation3 + $0xc], 16  ;;  %s1295_s19 = sld [smem:[#allocation5 + $0x5]] }
  0x79   :  { %s504_s22 = scalar_lea.vmem %s1686_s2, %s1295_s19 }
  0x7a   :  { %v524_v10 = vld [vmem:[%s504_s22] sm:$0x1] }
  0x7b   :  { %525 = vst [vmem:[#allocation2 + $0x5] sm:$0x1] %v524_v10 }
  0x7c   :  { %550 = vsyncadd [#allocation3 + $0x5], 16  ;;  %s1296_s23 = sld [smem:[#allocation6 + $0x5]] }
  0x82   :  { %s552_s26 = scalar_lea.vmem %s1687_s3, %s1296_s23 }
  0x83   :  { %v572_v11 = vld [vmem:[%s552_s26] sm:$0x1] }
  0x84   :  { %573 = vst [vmem:[#allocation2 + $0xd] sm:$0x1] %v572_v11 }
  0x85   :  { %598 = vsyncadd [#allocation3 + $0xd], 16  ;;  %s1297_s27 = sld [smem:[#allocation5 + $0x6]] }
  0x8b   :  { %s600_s0 = scalar_lea.vmem %s1686_s2, %s1297_s27 }
  0x8c   :  { %v620_v12 = vld [vmem:[%s600_s0] sm:$0x1] }
  0x8d   :  { %621 = vst [vmem:[#allocation2 + $0x6] sm:$0x1] %v620_v12 }
  0x8e   :  { %646 = vsyncadd [#allocation3 + $0x6], 16  ;;  %s1298_s1 = sld [smem:[#allocation6 + $0x6]] }
  0x94   :  { %s648_s8 = scalar_lea.vmem %s1687_s3, %s1298_s1 }
  0x95   :  { %v668_v13 = vld [vmem:[%s648_s8] sm:$0x1] }
  0x96   :  { %669 = vst [vmem:[#allocation2 + $0xe] sm:$0x1] %v668_v13 }
  0x97   :  { %694 = vsyncadd [#allocation3 + $0xe], 16  ;;  %s1299_s9 = sld [smem:[#allocation5 + $0x7]] }
  0x9d   :  { %s696_s12 = scalar_lea.vmem %s1686_s2, %s1299_s9 }
  0x9e   :  { %v716_v14 = vld [vmem:[%s696_s12] sm:$0x1] }
  0x9f   :  { %717 = vst [vmem:[#allocation2 + $0x7] sm:$0x1] %v716_v14 }
  0xa0   :  { %742 = vsyncadd [#allocation3 + $0x7], 16  ;;  %s1300_s13 = sld [smem:[#allocation6 + $0x7]] }
  0xa6   :  { %s744_s16 = scalar_lea.vmem %s1687_s3, %s1300_s13 }
  0xa7   :  { %v764_v15 = vld [vmem:[%s744_s16] sm:$0x1] }
  0xa8   :  { %765 = vst [vmem:[#allocation2 + $0xf] sm:$0x1] %v764_v15 }
  0xa9   :  { %790 = vsyncadd [#allocation3 + $0xf], 16 }
  0xaa   :  { %1465 = dma.done.wait [#allocation3], 16 }
  0xab   :  { %1466 = vsyncadd [#allocation3], 4294967280 }
  0xac   :  { %1467 = dma.done.wait [#allocation3 + $0x8], 16 }
  0xad   :  { %1468 = vsyncadd [#allocation3 + $0x8], 4294967280 }
  0xae   :  { %1469 = dma.done.wait [#allocation3 + $0x1], 16 }
  0xaf   :  { %1470 = vsyncadd [#allocation3 + $0x1], 4294967280 }
  0xb0   :  { %1471 = dma.done.wait [#allocation3 + $0x9], 16 }
  0xb1   :  { %1472 = vsyncadd [#allocation3 + $0x9], 4294967280 }
  0xb2   :  { %1473 = dma.done.wait [#allocation3 + $0x2], 16 }
  0xb3   :  { %1474 = vsyncadd [#allocation3 + $0x2], 4294967280 }
  0xb4   :  { %1475 = dma.done.wait [#allocation3 + $0xa], 16 }
  0xb5   :  { %1476 = vsyncadd [#allocation3 + $0xa], 4294967280 }
  0xb6   :  { %1477 = dma.done.wait [#allocation3 + $0x3], 16 }
  0xb7   :  { %1478 = vsyncadd [#allocation3 + $0x3], 4294967280 }
  0xb8   :  { %1479 = dma.done.wait [#allocation3 + $0xb], 16 }
  0xb9   :  { %1480 = vsyncadd [#allocation3 + $0xb], 4294967280 }
  0xba   :  { %1481 = dma.done.wait [#allocation3 + $0x4], 16 }
  0xbb   :  { %1482 = vsyncadd [#allocation3 + $0x4], 4294967280 }
  0xbc   :  { %1483 = dma.done.wait [#allocation3 + $0xc], 16 }
  0xbd   :  { %1484 = vsyncadd [#allocation3 + $0xc], 4294967280 }
  0xbe   :  { %1485 = dma.done.wait [#allocation3 + $0x5], 16 }
  0xbf   :  { %1486 = vsyncadd [#allocation3 + $0x5], 4294967280 }
  0xc0   :  { %1487 = dma.done.wait [#allocation3 + $0xd], 16 }
  0xc1   :  { %1488 = vsyncadd [#allocation3 + $0xd], 4294967280 }
  0xc2   :  { %1489 = dma.done.wait [#allocation3 + $0x6], 16 }
  0xc3   :  { %1490 = vsyncadd [#allocation3 + $0x6], 4294967280 }
  0xc4   :  { %1491 = dma.done.wait [#allocation3 + $0xe], 16 }
  0xc5   :  { %1492 = vsyncadd [#allocation3 + $0xe], 4294967280 }
  0xc6   :  { %1493 = dma.done.wait [#allocation3 + $0x7], 16 }
  0xc7   :  { %1494 = vsyncadd [#allocation3 + $0x7], 4294967280 }
  0xc8   :  { %1495 = dma.done.wait [#allocation3 + $0xf], 16 }
  0xc9   :  { %1496 = vsyncadd [#allocation3 + $0xf], 4294967280  ;;  %vm849_vm0 = vcmask 261120   ;;  %v826_v17 = vld [vmem:[%s1688_s4] sm:$0xff]  ;;  %v827_v18 = vld [vmem:[%s1688_s4 + $0x8] sm:$0xff] }
  0xca   :  { %vm1590_vm1 = vmpackc.low %vm849_vm0, %vm849_vm0  ;;  %v828_v19 = vld [vmem:[%s1688_s4 + $0x10] sm:$0xff]  ;;  %v1389_v20 = vpack.c.bf16 %v827_v18, %v826_v17  ;;  %v829_v21 = vld [vmem:[%s1688_s4 + $0x18] sm:$0xff] }
  0xcb   :  { %v1395_v22 = vpack.c.bf16 %v829_v21, %v828_v19  ;;  %v824_v23 = vld [vmem:[#allocation2] sm:$0xff]  ;;  %v831_v25 = vld [vmem:[%s1688_s4 + $0x28] sm:$0xff]  ;;  %v832_v27 = vld [vmem:[%s1688_s4 + $0x30] sm:$0xff] }
  0xcc   :  { %1391 = vmatprep.subr.msk.bf16.mxu0 %vm1590_vm1, %v1389_v20  ;;  %v830_v24 = vld [vmem:[%s1688_s4 + $0x20] sm:$0xff]  ;;  %1386 = vmatprep.mubr.msk.f32.mxu0 %vm849_vm0, %v824_v23  ;;  %v833_v28 = vld [vmem:[%s1688_s4 + $0x38] sm:$0xff]  ;;  %v835_v31 = vld [vmem:[%s1688_s4 + $0x48] sm:$0xff] }
  0xcd   :  { %1394 = vmatpush3.bf16.xpose.msk.msra.mxu0 %vm1590_vm1, %v1389_v20  ;;  %v1401_v26 = vpack.c.bf16 %v831_v25, %v830_v24  ;;  %v1407_v29 = vpack.c.bf16 %v833_v28, %v832_v27  ;;  %v834_v30 = vld [vmem:[%s1688_s4 + $0x40] sm:$0xff]  ;;  %v836_v33 = vld [vmem:[%s1688_s4 + $0x50] sm:$0xff]  ;;  %v837_v34 = vld [vmem:[%s1688_s4 + $0x58] sm:$0xff] }
  0xce   :  { %1397 = vmatprep.subr.msk.bf16.mxu0 %vm1590_vm1, %v1395_v22  ;;  %v1413_v32 = vpack.c.bf16 %v835_v31, %v834_v30  ;;  %v1419_v35 = vpack.c.bf16 %v837_v34, %v836_v33  ;;  %v838_v36 = vld [vmem:[%s1688_s4 + $0x60] sm:$0xff]  ;;  %v839_v37 = vld [vmem:[%s1688_s4 + $0x68] sm:$0xff]  ;;  %v840_v39 = vld [vmem:[%s1688_s4 + $0x70] sm:$0xff] }
  0xcf   :  { %v1425_v38 = vpack.c.bf16 %v839_v37, %v838_v36  ;;  %v841_v40 = vld [vmem:[%s1688_s4 + $0x78] sm:$0xff]  ;;  %v825_v42 = vld [vmem:[#allocation2 + $0x8] sm:$0xff]  ;;  %v1301_v43 = vld [vmem:[%s1689_s5] ss:$0 sm:$0xff] }
  0xd0   :  { %v1431_v41 = vpack.c.bf16 %v841_v40, %v840_v39 }
  0xd5   :  { %1400 = vmatpush3.bf16.xpose.msk.msra.mxu0 %vm1590_vm1, %v1395_v22 }
  0xd6   :  { %1403 = vmatprep.subr.msk.bf16.mxu0 %vm1590_vm1, %v1401_v26 }
  0xdd   :  { %1406 = vmatpush3.bf16.xpose.msk.msra.mxu0 %vm1590_vm1, %v1401_v26 }
  0xde   :  { %1409 = vmatprep.subr.msk.bf16.mxu0 %vm1590_vm1, %v1407_v29 }
  0xe5   :  { %1412 = vmatpush3.bf16.xpose.msk.msra.mxu0 %vm1590_vm1, %v1407_v29 }
  0xe6   :  { %1415 = vmatprep.subr.msk.bf16.mxu0 %vm1590_vm1, %v1413_v32 }
  0xed   :  { %1418 = vmatpush3.bf16.xpose.msk.msra.mxu0 %vm1590_vm1, %v1413_v32 }
  0xee   :  { %1421 = vmatprep.subr.msk.bf16.mxu0 %vm1590_vm1, %v1419_v35 }
  0xf5   :  { %1424 = vmatpush3.bf16.xpose.msk.msra.mxu0 %vm1590_vm1, %v1419_v35 }
  0xf6   :  { %1427 = vmatprep.subr.msk.bf16.mxu0 %vm1590_vm1, %v1425_v38 }
  0xfd   :  { %1430 = vmatpush3.bf16.xpose.msk.msra.mxu0 %vm1590_vm1, %v1425_v38 }
  0xfe   :  { %1433 = vmatprep.subr.msk.bf16.mxu0 %vm1590_vm1, %v1431_v41 }
 0x105   :  { %1436 = vmatpush3.bf16.xpose.msk.msra.mxu0 %vm1590_vm1, %v1431_v41 }
 0x10c   :  { %1387 = vmatmul.mubr.msk.f32.vlgmr.msra.gmra.mrb[0].mxu0 %vm849_vm0, %v825_v42 }
 0x1df   :  { %v1388_v44 = vpop.f32.mrb[0].mxu0 }
 0x1e0   :  { %v976_v45 = vadd.f32 %v1388_v44, %v1301_v43  ;;  %v970_v46 = vpop.f32.mrb[1].mxu0 }
 0x1e1   :  { %v971_v47 = vadd.f32 %v1301_v43, %v970_v46 }
 0x1e2   :  { %980 = vst [vmem:[%s1690_s6 + $0x8] sm:$0xff] %v976_v45 }
 0x1e3   :  { %979 = vst [vmem:[%s1690_s6] sm:$0xff] %v971_v47 }
 0x1e4   :  { %985 = vsyncmov [#allocation3] }
 0x1e7   :  { %s986_s24 = vpop.sfrf %985 }
 0x1e8   :  { %p1320_p10 = scmp.ne.s32.totalorder %s986_s24, 0 }
 0x1ea   :  { %990 = shalt.err (%p1320_p10)  }
 0x1eb   :  { %992 = vsyncmov [#allocation3 + $0x1] }
 0x1ee   :  { %s993_s25 = vpop.sfrf %992 }
 0x1ef   :  { %p1321_p11 = scmp.ne.s32.totalorder %s993_s25, 0 }
 0x1f1   :  { %997 = shalt.err (%p1321_p11)  }
 0x1f2   :  { %999 = vsyncmov [#allocation3 + $0x2] }
 0x1f5   :  { %s1000_s5 = vpop.sfrf %999 }
 0x1f6   :  { %p1322_p12 = scmp.ne.s32.totalorder %s1000_s5, 0 }
 0x1f8   :  { %1004 = shalt.err (%p1322_p12)  }
 0x1f9   :  { %1006 = vsyncmov [#allocation3 + $0x3] }
 0x1fc   :  { %s1007_s26 = vpop.sfrf %1006 }
 0x1fd   :  { %p1323_p13 = scmp.ne.s32.totalorder %s1007_s26, 0 }
 0x1ff   :  { %1011 = shalt.err (%p1323_p13)  }
 0x200   :  { %1013 = vsyncmov [#allocation3 + $0x4] }
 0x203   :  { %s1014_s27 = vpop.sfrf %1013 }
 0x204   :  { %p1324_p0 = scmp.ne.s32.totalorder %s1014_s27, 0 }
 0x206   :  { %1018 = shalt.err (%p1324_p0)  }
 0x207   :  { %1020 = vsyncmov [#allocation3 + $0x5] }
 0x20a   :  { %s1021_s6 = vpop.sfrf %1020 }
 0x20b   :  { %p1325_p1 = scmp.ne.s32.totalorder %s1021_s6, 0 }
 0x20d   :  { %1025 = shalt.err (%p1325_p1)  }
 0x20e   :  { %1027 = vsyncmov [#allocation3 + $0x6] }
 0x211   :  { %s1028_s28 = vpop.sfrf %1027 }
 0x212   :  { %p1326_p2 = scmp.ne.s32.totalorder %s1028_s28, 0 }
 0x214   :  { %1032 = shalt.err (%p1326_p2)  }
 0x215   :  { %1034 = vsyncmov [#allocation3 + $0x7] }
 0x218   :  { %s1035_s29 = vpop.sfrf %1034 }
 0x219   :  { %p1327_p3 = scmp.ne.s32.totalorder %s1035_s29, 0 }
 0x21b   :  { %1039 = shalt.err (%p1327_p3)  }
 0x21c   :  { %1041 = vsyncmov [#allocation3 + $0x8] }
 0x21f   :  { %s1042_s0 = vpop.sfrf %1041 }
 0x220   :  { %p1328_p4 = scmp.ne.s32.totalorder %s1042_s0, 0 }
 0x222   :  { %1046 = shalt.err (%p1328_p4)  }
 0x223   :  { %1048 = vsyncmov [#allocation3 + $0x9] }
 0x226   :  { %s1049_s1 = vpop.sfrf %1048 }
 0x227   :  { %p1329_p5 = scmp.ne.s32.totalorder %s1049_s1, 0 }
 0x229   :  { %1053 = shalt.err (%p1329_p5)  }
 0x22a   :  { %1055 = vsyncmov [#allocation3 + $0xa] }
 0x22d   :  { %s1056_s30 = vpop.sfrf %1055 }
 0x22e   :  { %p1330_p6 = scmp.ne.s32.totalorder %s1056_s30, 0 }
 0x230   :  { %1060 = shalt.err (%p1330_p6)  }
 0x231   :  { %1062 = vsyncmov [#allocation3 + $0xb] }
 0x234   :  { %s1063_s7 = vpop.sfrf %1062 }
 0x235   :  { %p1331_p7 = scmp.ne.s32.totalorder %s1063_s7, 0 }
 0x237   :  { %1067 = shalt.err (%p1331_p7)  }
 0x238   :  { %1069 = vsyncmov [#allocation3 + $0xc] }
 0x23b   :  { %s1070_s8 = vpop.sfrf %1069 }
 0x23c   :  { %p1332_p8 = scmp.ne.s32.totalorder %s1070_s8, 0 }
 0x23e   :  { %1074 = shalt.err (%p1332_p8)  }
 0x23f   :  { %1076 = vsyncmov [#allocation3 + $0xd] }
 0x242   :  { %s1077_s9 = vpop.sfrf %1076 }
 0x243   :  { %p1333_p9 = scmp.ne.s32.totalorder %s1077_s9, 0 }
 0x245   :  { %1081 = shalt.err (%p1333_p9)  }
 0x246   :  { %1083 = vsyncmov [#allocation3 + $0xe] }
 0x249   :  { %s1084_s10 = vpop.sfrf %1083 }
 0x24a   :  { %p1334_p10 = scmp.ne.s32.totalorder %s1084_s10, 0 }
 0x24c   :  { %1088 = shalt.err (%p1334_p10)  }
 0x24d   :  { %1090 = vsyncmov [#allocation3 + $0xf] }
 0x250   :  { %s1091_s11 = vpop.sfrf %1090 }
 0x251   :  { %p1335_p11 = scmp.ne.s32.totalorder %s1091_s11, 0 }
 0x253   :  { %1095 = shalt.err (%p1335_p11)  }

</bundles_post_ra>
